<compile_context>
chip_gen: v7x
topology: tpu7x:2x2x1
jax: 0.10.0
libtpu: 0.0.40
codegen_flags: <defaults>
</compile_context>

<pallas_src>
import jax
import jax.numpy as jnp
from jax import lax
from jax.experimental import pallas as pl
from jax.experimental.pallas import tpu as pltpu


def _round_up(a: int, b: int) -> int:
    return ((a + b - 1) // b) * b


def _pad2d(a, rows: int, cols: int, dtype):
    """Cast and pad to (rows, cols); no copy beyond the cast when aligned."""
    a = a.astype(dtype)
    r, c = a.shape
    if r == rows and c == cols:
        return a
    return jnp.pad(a, ((0, rows - r), (0, cols - c)))


def _tile_cap(fp: int, budget: int = 24 << 20) -> int:
    """Largest 128-multiple tile edge whose per-step working set fits budget."""
    t = 2048
    # per-step bytes for a t x t bf16 H tile (double-buffered) plus
    # double-buffered bf16 z/y tiles and an f32 accumulator at width fp.
    while t > 256 and (4 * t * t + 12 * t * fp) > budget:
        t //= 2
    return t


def _pick_tile(dim: int, tmax: int):
    """128-aligned tile edge + padded extent; prefer >=2 tiles (v7x 2 TCs)."""
    tmax = max(128, (tmax // 128) * 128)
    t = min(tmax, _round_up(dim, 128))
    if dim > 128 and _round_up(dim, t) == t:   # single tile -> split in two
        t = _round_up((dim + 1) // 2, 128)
    return t, _round_up(dim, t)


# ---------------- pass 0: z = dv2 * (x @ weight) ----------------------------
def _xw_kernel(x_ref, w_ref, dv2_ref, z_ref, acc_ref):
    k = pl.program_id(1)

    @pl.when(k == 0)
    def _():
        acc_ref[...] = jnp.zeros_like(acc_ref)

    acc_ref[...] += jnp.dot(x_ref[...], w_ref[...],
                            preferred_element_type=jnp.float32)

    @pl.when(k == pl.num_programs(1) - 1)
    def _():
        z_ref[...] = (dv2_ref[...] * acc_ref[...]).astype(z_ref.dtype)


# ---------------- pass 1: y = (W/DE) * (H^T @ z) -----------------------------
def _make_edge_kernel(tn: int, z_resident: bool):
    def kernel(h_ref, z_ref, esc_ref, y_ref, acc_ref):
        n = pl.program_id(1)

        @pl.when(n == 0)
        def _():
            acc_ref[...] = jnp.zeros_like(acc_ref)

        if z_resident:
            start = pl.multiple_of(n * tn, tn)
            z_blk = z_ref[pl.ds(start, tn), :]
        else:
            z_blk = z_ref[...]

        # h block is (tn, te); contract over the node dim (dim 0) -> (te, F).
        acc_ref[...] += lax.dot_general(
            h_ref[...], z_blk, (((0,), (0,)), ((), ())),
            preferred_element_type=jnp.float32)

        @pl.when(n == pl.num_programs(1) - 1)
        def _():
            y_ref[...] = (esc_ref[...] * acc_ref[...]).astype(y_ref.dtype)

    return kernel


# ---------------- pass 2: out = dv2 * (H @ y) + bias -------------------------
def _make_node_kernel(te: int, y_resident: bool):
    def kernel(h_ref, y_ref, dv2_ref, b_ref, o_ref, acc_ref):
        e = pl.program_id(1)

        @pl.when(e == 0)
        def _():
            acc_ref[...] = jnp.zeros_like(acc_ref)

        if y_resident:
            start = pl.multiple_of(e * te, te)
            y_blk = y_ref[pl.ds(start, te), :]
        else:
            y_blk = y_ref[...]

        acc_ref[...] += jnp.dot(h_ref[...], y_blk,
                                preferred_element_type=jnp.float32)

        @pl.when(e == pl.num_programs(1) - 1)
        def _():
            o_ref[...] = dv2_ref[...] * acc_ref[...] + b_ref[...]

    return kernel


def hgnn_conv(x, H, W, weight, bias=None, *, tn: int = 1024, te: int = 1024):
    """HGNN_conv forward. x:(N,in_ft) H:(N,E) W:(E,) weight:(in_ft,out_ft)."""
    N, in_ft = x.shape
    E = H.shape[1]
    out_ft = weight.shape[1]
    f32, bf16 = jnp.float32, jnp.bfloat16

    # ---- tiling (lane-dense, VMEM-budgeted, >=2 parallel tiles when possible)
    Fp = _round_up(out_ft, 128)
    cap = _tile_cap(Fp)
    tn_eff, Np = _pick_tile(N, min(tn, cap))
    te_eff, Ep = _pick_tile(E, min(te, cap))
    n_tiles = Np // tn_eff
    e_tiles = Ep // te_eff

    # K (in_ft) tiling for pass 0 — guard against huge x/weight blocks in VMEM.
    if in_ft > 2048:
        tk = 2048 if Fp <= 1024 else 512
        Kp = _round_up(in_ft, tk)
    else:
        tk, Kp = in_ft, in_ft
    k_tiles = Kp // tk

    # ---- single bf16 materialization of operands (no copy when aligned) -----
    h_p = _pad2d(H, Np, Ep, bf16)                       # only copy of H
    x_p = _pad2d(x, Np, Kp, bf16)
    w_p = _pad2d(weight, Kp, Fp, bf16)

    # degree reductions from the already-materialized bf16 H (f32 accumulate);
    # padded rows/cols are zero so they fall into the zero-degree guard.
    DVp = jnp.sum(h_p, axis=1, dtype=f32)               # (Np,)
    DEp = jnp.sum(h_p, axis=0, dtype=f32)               # (Ep,)
    dv2_p = jnp.where(DVp > 0, lax.rsqrt(jnp.maximum(DVp, 1e-30)),
                      0.0).reshape(Np, 1)
    W_p = W.astype(f32)
    if Ep != E:
        W_p = jnp.pad(W_p, (0, Ep - E))
    esc_p = jnp.where(DEp > 0, W_p / jnp.maximum(DEp, 1e-30),
                      0.0).reshape(Ep, 1)

    if bias is None:
        b_p = jnp.zeros((1, Fp), f32)
    else:
        b_p = bias.astype(f32).reshape(1, out_ft)
        if Fp != out_ft:
            b_p = jnp.pad(b_p, ((0, 0), (0, Fp - out_ft)))

    # Keep z / y fully VMEM-resident in the reduction passes when small enough
    # (removes e_tiles x / n_tiles x re-streaming in a bandwidth-bound regime).
    z_resident = 2 * Np * Fp * 2 <= (8 << 20)
    y_resident = 2 * Ep * Fp * 2 <= (8 << 20)

    # ---- pass 0: z = dv2 * (x @ weight)   (N tiles parallel, K reduce) ------
    z = pl.pallas_call(
        _xw_kernel,
        out_shape=jax.ShapeDtypeStruct((Np, Fp), bf16),
        grid_spec=pltpu.PrefetchScalarGridSpec(
            num_scalar_prefetch=0,
            grid=(n_tiles, k_tiles),
            in_specs=[
                pl.BlockSpec((tn_eff, tk), lambda i, k: (i, k)),
                pl.BlockSpec((tk, Fp), lambda i, k: (k, 0)),
                pl.BlockSpec((tn_eff, 1), lambda i, k: (i, 0)),
            ],
            out_specs=pl.BlockSpec((tn_eff, Fp), lambda i, k: (i, 0)),
            scratch_shapes=[pltpu.VMEM((tn_eff, Fp), f32)],
        ),
        compiler_params=pltpu.CompilerParams(
            dimension_semantics=("parallel", "arbitrary")),
    )(x_p, w_p, dv2_p)

    # ---- pass 1: y = (W/DE) * (H^T @ z)   (E tiles parallel, N reduce) ------
    if z_resident:
        z_spec = pl.BlockSpec((Np, Fp), lambda e, n: (0, 0))
    else:
        z_spec = pl.BlockSpec((tn_eff, Fp), lambda e, n: (n, 0))
    y = pl.pallas_call(
        _make_edge_kernel(tn_eff, z_resident),
        out_shape=jax.ShapeDtypeStruct((Ep, Fp), bf16),
        grid_spec=pltpu.PrefetchScalarGridSpec(
            num_scalar_prefetch=0,
            grid=(e_tiles, n_tiles),
            in_specs=[
                pl.BlockSpec((tn_eff, te_eff), lambda e, n: (n, e)),  # raw H
                z_spec,
                pl.BlockSpec((te_eff, 1), lambda e, n: (e, 0)),
            ],
            out_specs=pl.BlockSpec((te_eff, Fp), lambda e, n: (e, 0)),
            scratch_shapes=[pltpu.VMEM((te_eff, Fp), f32)],
        ),
        compiler_params=pltpu.CompilerParams(
            dimension_semantics=("parallel", "arbitrary")),
    )(h_p, z, esc_p)

    # ---- pass 2: out = dv2 * (H @ y) + bias   (N tiles parallel, E reduce) --
    if y_resident:
        y_spec = pl.BlockSpec((Ep, Fp), lambda i, e: (0, 0))
    else:
        y_spec = pl.BlockSpec((te_eff, Fp), lambda i, e: (e, 0))
    out_p = pl.pallas_call(
        _make_node_kernel(te_eff, y_resident),
        out_shape=jax.ShapeDtypeStruct((Np, Fp), f32),
        grid_spec=pltpu.PrefetchScalarGridSpec(
            num_scalar_prefetch=0,
            grid=(n_tiles, e_tiles),
            in_specs=[
                pl.BlockSpec((tn_eff, te_eff), lambda i, e: (i, e)),  # raw H
                y_spec,
                pl.BlockSpec((tn_eff, 1), lambda i, e: (i, 0)),
                pl.BlockSpec((1, Fp), lambda i, e: (0, 0)),
            ],
            out_specs=pl.BlockSpec((tn_eff, Fp), lambda i, e: (i, 0)),
            scratch_shapes=[pltpu.VMEM((tn_eff, Fp), f32)],
        ),
        compiler_params=pltpu.CompilerParams(
            dimension_semantics=("parallel", "arbitrary")),
    )(h_p, y, dv2_p, b_p)

    return out_p[:N, :out_ft]


def hgnn_conv_ref(x, H, W, weight, bias):
    """Pure-JAX f32 reference mirroring the PyTorch module."""
    DV = jnp.sum(H, axis=1)
    DE = jnp.sum(H, axis=0)
    DV2 = jnp.diag(jnp.power(DV, -0.5))
    invDE = jnp.diag(jnp.power(DE, -1.0))
    DV2_H = DV2 @ H
    invDE_HT_DV2 = invDE @ H.T @ DV2
    y = x @ weight
    y = invDE_HT_DV2 @ y
    y = jnp.diag(W) @ y
    y = DV2_H @ y
    return y + bias


if __name__ == "__main__":
    # Small but multi-tile problem (3 N-tiles x 2 E-tiles at tn=te=128):
    # exercises both reduction accumulators, the resident z/y paths, the
    # transposed-LHS dot_general, and the out_ft -> 128 lane padding.
    N, E, in_ft, out_ft = 384, 256, 64, 32

    key = jax.random.PRNGKey(0)
    kx, kh, kw, kwt, kb = jax.random.split(key, 5)

    x = jax.random.normal(kx, (N, in_ft), dtype=jnp.float32)
    # strictly positive incidence weights -> no zero degrees in the reference
    H = jax.random.uniform(kh, (N, E), dtype=jnp.float32, minval=0.1, maxval=1.0)
    W = jax.random.uniform(kw, (E,), dtype=jnp.float32, minval=0.5, maxval=1.5)

    # reset_parameters(): uniform(-stdv, stdv), stdv = 1/sqrt(out_ft)
    stdv = 1.0 / (out_ft ** 0.5)
    weight = jax.random.uniform(kwt, (in_ft, out_ft), dtype=jnp.float32,
                                minval=-stdv, maxval=stdv)
    bias = jax.random.uniform(kb, (out_ft,), dtype=jnp.float32,
                              minval=-stdv, maxval=stdv)

    out = hgnn_conv(x, H, W, weight, bias, tn=128, te=128)
    out = jax.block_until_ready(out)

    ref = hgnn_conv_ref(x, H, W, weight, bias)
    assert out.shape == (N, out_ft)
    # bf16 MXU operands (f32 accumulation) -> relaxed tolerance vs f32 reference
    max_err = float(jnp.max(jnp.abs(out - ref)))
    assert jnp.allclose(out, ref, atol=2e-2, rtol=2e-2), (
        f"mismatch vs reference (max abs err {max_err})")

    print("KERNEL_OK")
</pallas_src>

<mosaic_0001>
module attributes {stable_mosaic.version = 11 : i64} {
  func.func @_xw_kernel(%arg0: i32, %arg1: i32, %arg2: memref<128x64xbf16, #tpu.memory_space<vmem>>, %arg3: memref<64x128xbf16, #tpu.memory_space<vmem>>, %arg4: memref<128x1xf32, #tpu.memory_space<vmem>>, %arg5: memref<128x128xbf16, #tpu.memory_space<vmem>>, %arg6: memref<128x128xf32, #tpu.memory_space<vmem>>) attributes {dimension_semantics = [#tpu.dimension_semantics<parallel>, #tpu.dimension_semantics<arbitrary>], iteration_bounds = array<i64: 3, 1>, scalar_prefetch = 0 : i64, scratch_operands = 1 : i64, tpu.core_type = #tpu.core_type<tc>, window_params = [{transform_indices = @transform_0, window_bounds = array<i64: 128, 64>}, {transform_indices = @transform_1, window_bounds = array<i64: 64, 128>}, {transform_indices = @transform_2, window_bounds = array<i64: 128, 1>}, {transform_indices = @transform_3, window_bounds = array<i64: 128, 128>}]} {
    %c0_i32 = arith.constant 0 : i32
    %0 = arith.cmpi eq, %arg1, %c0_i32 : i32
    %1 = arith.extui %0 : i1 to i32
    %c0_i32_0 = arith.constant 0 : i32
    %2 = arith.cmpi ne, %1, %c0_i32_0 : i32
    scf.if %2 {
      %cst_10 = arith.constant 0.000000e+00 : f32
      %12 = vector.broadcast %cst_10 : f32 to vector<128x128xf32>
      %c0_11 = arith.constant 0 : index
      %c0_12 = arith.constant 0 : index
      %13 = vector.load %arg6[%c0_11, %c0_12] : memref<128x128xf32, #tpu.memory_space<vmem>>, vector<128x128xf32>
      tpu.vector_store %arg6[%c0_11, %c0_12], %12 {strides = array<i32>} : memref<128x128xf32, #tpu.memory_space<vmem>>, vector<128x128xf32>,
    } else {
    }
    %c0 = arith.constant 0 : index
    %c0_1 = arith.constant 0 : index
    %3 = vector.load %arg6[%c0, %c0_1] : memref<128x128xf32, #tpu.memory_space<vmem>>, vector<128x128xf32>
    %c0_2 = arith.constant 0 : index
    %c0_3 = arith.constant 0 : index
    %4 = vector.load %arg2[%c0_2, %c0_3] : memref<128x64xbf16, #tpu.memory_space<vmem>>, vector<128x64xbf16>
    %c0_4 = arith.constant 0 : index
    %c0_5 = arith.constant 0 : index
    %5 = vector.load %arg3[%c0_4, %c0_5] : memref<64x128xbf16, #tpu.memory_space<vmem>>, vector<64x128xbf16>
    %cst = arith.constant dense<0.000000e+00> : vector<128x128xf32>
    %6 = tpu.matmul %4, %5, %cst {dimension_numbers = #tpu.dot_dimension_numbers<[1], [0], [0], [1], [0, 0, 1, 1], [], []>} : vector<128x64xbf16>, vector<64x128xbf16>, vector<128x128xf32> -> vector<128x128xf32>
    %7 = arith.addf %3, %6 : vector<128x128xf32>
    %c0_6 = arith.constant 0 : index
    %c0_7 = arith.constant 0 : index
    %8 = vector.load %arg6[%c0_6, %c0_7] : memref<128x128xf32, #tpu.memory_space<vmem>>, vector<128x128xf32>
    tpu.vector_store %arg6[%c0_6, %c0_7], %7 {strides = array<i32>} : memref<128x128xf32, #tpu.memory_space<vmem>>, vector<128x128xf32>,
    %c0_i32_8 = arith.constant 0 : i32
    %9 = arith.cmpi eq, %arg1, %c0_i32_8 : i32
    %10 = arith.extui %9 : i1 to i32
    %c0_i32_9 = arith.constant 0 : i32
    %11 = arith.cmpi ne, %10, %c0_i32_9 : i32
    scf.if %11 {
      %c0_10 = arith.constant 0 : index
      %c0_11 = arith.constant 0 : index
      %12 = vector.load %arg4[%c0_10, %c0_11] : memref<128x1xf32, #tpu.memory_space<vmem>>, vector<128x1xf32>
      %c0_12 = arith.constant 0 : index
      %c0_13 = arith.constant 0 : index
      %13 = vector.load %arg6[%c0_12, %c0_13] : memref<128x128xf32, #tpu.memory_space<vmem>>, vector<128x128xf32>
      %14 = vector.broadcast %12 : vector<128x1xf32> to vector<128x128xf32>
      %15 = arith.mulf %14, %13 : vector<128x128xf32>
      %16 = arith.truncf %15 : vector<128x128xf32> to vector<128x128xbf16>
      %c0_14 = arith.constant 0 : index
      %c0_15 = arith.constant 0 : index
      %17 = vector.load %arg5[%c0_14, %c0_15] : memref<128x128xbf16, #tpu.memory_space<vmem>>, vector<128x128xbf16>
      tpu.vector_store %arg5[%c0_14, %c0_15], %16 {strides = array<i32>} : memref<128x128xbf16, #tpu.memory_space<vmem>>, vector<128x128xbf16>,
    } else {
    }
    return
  }
  func.func @transform_0(%arg0: i32, %arg1: i32) -> (i32, i32) {
    %c0_i32 = arith.constant 0 : i32
    return %arg0, %arg1 : i32, i32
  }
  func.func @transform_1(%arg0: i32, %arg1: i32) -> (i32, i32) {
    %c0_i32 = arith.constant 0 : i32
    %c0_i32_0 = arith.constant 0 : i32
    return %arg1, %c0_i32 : i32, i32
  }
  func.func @transform_2(%arg0: i32, %arg1: i32) -> (i32, i32) {
    %c0_i32 = arith.constant 0 : i32
    %c0_i32_0 = arith.constant 0 : i32
    return %arg0, %c0_i32 : i32, i32
  }
  func.func @transform_3(%arg0: i32, %arg1: i32) -> (i32, i32) {
    %c0_i32 = arith.constant 0 : i32
    %c0_i32_0 = arith.constant 0 : i32
    return %arg0, %c0_i32 : i32, i32
  }
}

</mosaic_0001>

<bundles_post_ra>
// kernel: tpu_custom_call.1
= control target key start
LH: loop header
LB: loop body
LE: loop exit
PB: predicated region body
PF: predicated region fallthrough
CT: control target
= control target key end

     0   :  { %8 = vsyncpa [#allocation4], 0  ;;  %s1359_s0 = inlined_call_operand.vmem [shape: bf16[384,64], index: 0, kind: input, shape index: {}]   ;;  %s1360_s1 = inlined_call_operand.vmem [shape: bf16[64,128], index: 1, kind: input, shape index: {}]   ;;  %s1361_s2 = inlined_call_operand.vmem [shape: f32[384,1], index: 2, kind: input, shape index: {}]   ;;  %s1362_s3 = inlined_call_operand.hbm [shape: bf16[384,128], index: 3, kind: output, shape index: {}]  }
   0x1   :  { %10 = vsyncpa [#allocation4 + $0x1], 0  ;;  %s1179_s12 = smov 0   ;;  %s1181_s13 = smov 0  }
   0x2   :  { %s1183_s14 = smov 0   ;;  %s1185_s15 = smov 0  }
   0x3   :  { %s1187_s16 = smov 0   ;;  %s1189_s17 = smov 0  }
   0x4 LB: > { %s843_s18 = sadd.s32 4294967295, %s1153_s17   ;;  %s844_s19 = sadd.s32 4294967294, %s1153_s17   ;;  %s1153_s17 = sphi %s1189_s17, %s16_s17   ;;  %s1149_s16 = sphi %s1187_s16, %s1369_s16   ;;  %s1145_s15 = sphi %s1185_s15, %s1368_s15   ;;  %s1141_s14 = sphi %s1183_s14, %s1367_s14   ;;  %s1137_s13 = sphi %s1181_s13, %s1366_s13   ;;  %s1133_s12 = sphi %s1179_s12, %s1365_s12  }
   0x5   : > { %s28_s20 = sadd.s32 1, %s1149_s16  ;;  %s115_s21 = sadd.s32 1, %s1141_s14 }
   0x6   : > { %p30_p0 = scmp.ge.s32.totalorder %s28_s20, 3  ;;  %p125_p1 = scmp.ne.s32.totalorder %s1141_s14, %s1137_s13 }
   0x7   : > { %p126_p2 = scmp.eq.s32.totalorder %s843_s18, 2  ;;  %p131_p3 = scmp.ne.s32.totalorder %s1137_s13, %s1133_s12 }
   0x8   : > { %s1371_s20 = smov (%p30_p0, %s28_s20), 0  ;;  %p132_p5 = scmp.eq.s32.totalorder %s844_s19, 2 }
   0x9   : > { %p1219_p4 = por %p126_p2, %p125_p1  ;;  %s112_s23 = ssub.s32 %s1149_s16, %s1371_s20 }
   0xa   : > { %p848_p6 = scmp.ge.s32.totalorder %s1153_s17, 1  ;;  %p113_p7 = scmp.eq.s32.totalorder %s112_s23, 0 }
   0xb   : > { %p1226_p8 = por %p132_p5, %p131_p3  ;;  %p180_p9 = scmp.lt.s32.totalorder %s1153_s17, 4 }
   0xc   : > { %s1232_s25 = scalar_select %p113_p7, %s1141_s14, %s115_s21  }
   0xd   : > { %p181_p10 = pnand %p848_p6, %p180_p9 }
   0xe   : > { %v1063_v0 = vld [vmem:[%s1360_s1] sm:$0xff] (!%p181_p10)   ;;  %s850_s28 = sshll.u32 (!%p181_p10), %s1145_s15, 4  ;;  %v1064_v1 = vld [vmem:[%s1360_s1 + $0x8] sm:$0xff] (!%p181_p10)   ;;  %v1065_v2 = vld [vmem:[%s1360_s1 + $0x10] sm:$0xff] (!%p181_p10)   ;;  %v1155_v3 = vmov (!%p181_p10), 0   ;;  %vm364_vm0 = vcmask (!%p181_p10), 523264  }
   0xf   : > { %184 = sbr.rel (%p181_p10) target bundleno = 273 (0x111), region = 32  ;;  %p218_p11 = scmp.lt.s32.totalorder (!%p181_p10), %s850_s28, 47  ;;  %971 = vmatprep.subr.bf16.mxu0 (!%p181_p10), %v1063_v0  ;;  %995 = vmatprep.subr.bf16.mxu1 (!%p181_p10), %v1063_v0  ;;  %v1066_v4 = vld [vmem:[%s1360_s1 + $0x18] sm:$0xff] (!%p181_p10)  }
  0x10   : > { %972 = vmatpush3.bf16.msra.mxu0 (!%p181_p10), %v1063_v0  ;;  %999 = vmatpush3.bf16.msra.mxu1 (!%p181_p10), %v1063_v0  ;;  %s214_s26 = sand.u32 (!%p181_p10), 1, %s1137_s13   ;;  %s911_s29 = sshll.u32 (!%p181_p10), %s1145_s15, 10 }
  0x11   : > { %973 = vmatprep.subr.bf16.mxu0 (!%p181_p10), %v1064_v1  ;;  %996 = vmatprep.subr.bf16.mxu1 (!%p181_p10), %v1064_v1  ;;  %s849_s27 = sshll.u32 (!%p181_p10), %s214_s26, 6  ;;  %s1303_s5 = scalar_lea.hbm (!%p181_p10), %s1362_s3, %s911_s29 }
  0x12   : > { %1062 = vset.pattern.permute.xlu1 (!%p181_p10), %v1155_v3  ;;  %1061 = vset.pattern.permute.xlu0 (!%p181_p10), %v1155_v3  ;;  %s1156_s8 = smov (!%p181_p10), [#allocation3]  }
  0x13   : > { %s1079_s9 = sshll.u32 (!%p181_p10), %s1156_s8, 4  ;;  %s1080_s9 = int_to_ptr.vmem [resolvable:$false] %s1079_s9 }
  0x14   : > { %974 = vmatpush3.bf16.msra.mxu0 (!%p181_p10), %v1064_v1  ;;  %1000 = vmatpush3.bf16.msra.mxu1 (!%p181_p10), %v1064_v1  ;;  %s1081_s10 = scalar_lea.vmem (!%p181_p10), %s1080_s9, 2048 }
  0x15   : > { %975 = vmatprep.subr.bf16.mxu0 (!%p181_p10), %v1065_v2  ;;  %997 = vmatprep.subr.bf16.mxu1 (!%p181_p10), %v1065_v2 }
  0x16   : > { %s1373_s28 = smov (!%p218_p11, %s850_s28), 47 }
  0x17   : > { %s851_s6 = sshll.u32 %s1373_s28, 2  ;;  %s853_s18 = sshll.u32 %s1373_s28, 3 }
  0x18   : > { %s1250_s11 = scalar_lea.vmem %s1359_s0, %s851_s6  ;;  %976 = vmatpush3.bf16.msra.mxu0 %v1065_v2  ;;  %1001 = vmatpush3.bf16.msra.mxu1 %v1065_v2  ;;  %s1260_s23 = scalar_lea.vmem %s1361_s2, %s853_s18 }
  0x19   : > { %v1067_v5 = vld [vmem:[%s1250_s11] sm:$0xff]   ;;  %977 = vmatprep.subr.bf16.mxu0 %v1066_v4  ;;  %998 = vmatprep.subr.bf16.mxu1 %v1066_v4  ;;  %v1069_v7 = vld [vmem:[%s1250_s11 + $0x8] sm:$0xff]   ;;  %v1071_v9 = vld [vmem:[%s1250_s11 + $0x10] sm:$0xff]   ;;  %s1292_s28 = scalar_lea.vmem [#allocation3], %s849_s27  ;;  %s1313_s6 = scalar_lea.sflag [#allocation4], %s214_s26 }
  0x1a   : > { %v1068_v6 = vld [vmem:[%s1250_s11 + $0x20] sm:$0xff]   ;;  %979 = vmatprep.mubr.msk.bf16.mxu0 %vm364_vm0, %v1067_v5  ;;  %v1070_v8 = vld [vmem:[%s1250_s11 + $0x28] sm:$0xff]   ;;  %v1072_v10 = vld [vmem:[%s1250_s11 + $0x30] sm:$0xff]   ;;  %s743_s30 = sshll.u32 %s1292_s28, 4  ;;  %s1305_s30 = int_to_ptr.vmem [resolvable:$true] %s743_s30 }
  0x1b   : > { %987 = vmatprep.mubr.msk.bf16.mxu1 %vm364_vm0, %v1068_v6  ;;  %v523_v11 = vld [vmem:[%s1260_s23 + $0x10] sm:$0xff]  ;;  %v521_v12 = vld [vmem:[%s1260_s23] sm:$0xff]  ;;  %v524_v13 = vld [vmem:[%s1260_s23 + $0x18] sm:$0xff]  ;;  %s1075_s7 = scalar_lea.vmem %s1305_s30, 1024  ;;  %p1082_p1 = scmp.lt.s32.totalorder %s1305_s30, %s1080_s9 }
  0x1c   : > { %978 = vmatpush3.bf16.msra.mxu0 %v1066_v4  ;;  %1002 = vmatpush3.bf16.msra.mxu1 %v1066_v4  ;;  %v522_v14 = vld [vmem:[%s1260_s23 + $0x8] sm:$0xff]  ;;  %v525_v16 = vld [vmem:[%s1260_s23 + $0x20] sm:$0xff]  ;;  %v1073_v17 = vld [vmem:[%s1250_s11 + $0x18] sm:$0xff]   ;;  %p1076_p12 = scmp.ne.s32.totalorder %s1305_s30, %s1075_s7  ;;  %p1083_p2 = scmp.lt.s32.totalorder %s1081_s10, %s1075_s7 }
  0x1d   : > { %565 = vperm.xlu1 %1062, %v523_v11   ;;  %555 = vperm.xlu0 %1061, %v521_v12   ;;  %v526_v15 = vld [vmem:[%s1260_s23 + $0x28] sm:$0xff]  ;;  %v1074_v18 = vld [vmem:[%s1250_s11 + $0x38] sm:$0xff]   ;;  %v527_v20 = vld [vmem:[%s1260_s23 + $0x30] sm:$0xff] }
  0x1e   : > { %v528_v19 = vld [vmem:[%s1260_s23 + $0x38] sm:$0xff]  ;;  %v530_v21 = vld [vmem:[%s1260_s23 + $0x48] sm:$0xff]  ;;  %v529_v22 = vld [vmem:[%s1260_s23 + $0x40] sm:$0xff]  ;;  %p1077_p13 = pnand %p1076_p12, %p1219_p4  ;;  %p1084_p3 = por %p1083_p2, %p1082_p1 }
  0x1f   : > { %980 = vmatmul.mubr.msk.bf16.vlgmr.msra.gmra.mrb[0].mxu0 %vm364_vm0, %v1069_v7  ;;  %988 = vmatmul.mubr.msk.bf16.vlgmr.msra.gmra.mrb[0].mxu1 %vm364_vm0, %v1070_v8  ;;  %v532_v23 = vld [vmem:[%s1260_s23 + $0x58] sm:$0xff]  ;;  %v531_v24 = vld [vmem:[%s1260_s23 + $0x50] sm:$0xff]  ;;  %v534_v25 = vld [vmem:[%s1260_s23 + $0x68] sm:$0xff] }
  0x20   : > { %983 = vmatprep.mubr.msk.bf16.mxu0 %vm364_vm0, %v1071_v9  ;;  %991 = vmatprep.mubr.msk.bf16.mxu1 %vm364_vm0, %v1072_v10  ;;  %v533_v26 = vld [vmem:[%s1260_s23 + $0x60] sm:$0xff]  ;;  %v536_v27 = vld [vmem:[%s1260_s23 + $0x78] sm:$0xff]  ;;  %v535_v28 = vld [vmem:[%s1260_s23 + $0x70] sm:$0xff]  ;;  %p1078_p0 = pneg %p1077_p13 }
  0x21   : > { %570 = vperm.xlu1 %1062, %v524_v13   ;;  %560 = vperm.xlu0 %1061, %v522_v14  }
  0x22   : > { %p1085_p5 = pnand %p1084_p3, %p1078_p0 }
  0x25   : > { %580 = vperm.xlu1 %1062, %v526_v15   ;;  %575 = vperm.xlu0 %1061, %v525_v16  }
  0x27   : > { %984 = vmatmul.mubr.msk.bf16.gmra.mrb[4].mxu0 %vm364_vm0, %v1073_v17  ;;  %992 = vmatmul.mubr.msk.bf16.gmra.mrb[4].mxu1 %vm364_vm0, %v1074_v18 }
  0x29   : > { %590 = vperm.xlu1 %1062, %v528_v19   ;;  %585 = vperm.xlu0 %1061, %v527_v20  }
  0x2d   : > { %600 = vperm.xlu1 %1062, %v530_v21   ;;  %595 = vperm.xlu0 %1061, %v529_v22  }
  0x31   : > { %610 = vperm.xlu1 %1062, %v532_v23   ;;  %605 = vperm.xlu0 %1061, %v531_v24  }
  0x35   : > { %620 = vperm.xlu1 %1062, %v534_v25   ;;  %615 = vperm.xlu0 %1061, %v533_v26  }
  0x39   : > { %630 = vperm.xlu1 %1062, %v536_v27   ;;  %625 = vperm.xlu0 %1061, %v535_v28  }
  0x9c   : > { %v566_v29 = vpop.permute.xlu1 %565  ;;  %v556_v30 = vpop.permute.xlu0 %555 }
  0xa0   : > { %v571_v31 = vpop.permute.xlu1 %570  ;;  %v561_v32 = vpop.permute.xlu0 %560 }
  0xa4   : > { %v581_v33 = vpop.permute.xlu1 %580  ;;  %v576_v34 = vpop.permute.xlu0 %575 }
  0xa8   : > { %v591_v35 = vpop.permute.xlu1 %590  ;;  %v586_v36 = vpop.permute.xlu0 %585 }
  0xac   : > { %v601_v37 = vpop.permute.xlu1 %600  ;;  %v596_v38 = vpop.permute.xlu0 %595 }
  0xb0   : > { %v611_v39 = vpop.permute.xlu1 %610  ;;  %v606_v40 = vpop.permute.xlu0 %605 }
  0xb4   : > { %v621_v41 = vpop.permute.xlu1 %620  ;;  %v616_v42 = vpop.permute.xlu0 %615 }
  0xb8   : > { %v631_v63 = vpop.permute.xlu1 %630  ;;  %v626_v0 = vpop.permute.xlu0 %625 }
  0xf2   : > { %v981_v43 = vpop.f32.mrb[0].mxu0  ;;  %v989_v44 = vpop.f32.mrb[0].mxu1 }
  0xf3   : > { %v423_v45 = vpop.f32.mrb[1].mxu0  ;;  %v455_v46 = vpop.f32.mrb[1].mxu1  ;;  %v635_v49 = vmul.f32 %v981_v43, %v566_v29  ;;  %v643_v50 = vmul.f32 %v989_v44, %v606_v40 }
  0xf4   : > { %v982_v47 = vpop.f32.mrb[2].mxu0  ;;  %v990_v48 = vpop.f32.mrb[2].mxu1  ;;  %v633_v55 = vmul.f32 %v556_v30, %v423_v45  ;;  %v641_v56 = vmul.f32 %v596_v38, %v455_v46 }
  0xf5   : > { %v636_v51 = vmul.f32 %v982_v47, %v571_v31  ;;  %v644_v52 = vmul.f32 %v990_v48, %v611_v39  ;;  %v426_v53 = vpop.f32.mrb[3].mxu0  ;;  %v458_v54 = vpop.f32.mrb[3].mxu1 }
  0xf6   : > { %v634_v57 = vmul.f32 %v561_v32, %v426_v53  ;;  %v642_v58 = vmul.f32 %v601_v37, %v458_v54 }
  0xf7   : > { %v920_v59 = vpack.c.bf16 %v636_v51, %v635_v49  ;;  %v940_v60 = vpack.c.bf16 %v644_v52, %v643_v50 }
  0xf8   : > { %v915_v61 = vpack.c.bf16 %v634_v57, %v633_v55  ;;  %v935_v62 = vpack.c.bf16 %v642_v58, %v641_v56 }
  0xf9   : > { %952 = vst [vmem:[%s1292_s28 + $0x8] sm:$0xff] %v920_v59   ;;  %956 = vst [vmem:[%s1292_s28 + $0x28] sm:$0xff] %v940_v60  }
  0xfa   : > { %916 = vst [vmem:[%s1292_s28] sm:$0xff] %v915_v61   ;;  %955 = vst [vmem:[%s1292_s28 + $0x20] sm:$0xff] %v935_v62   ;;  %v985_v1 = vpop.f32.mrb[4].mxu0  ;;  %v993_v2 = vpop.f32.mrb[4].mxu1 }
  0xfb   : > { %v439_v3 = vpop.f32.mrb[5].mxu0  ;;  %v471_v4 = vpop.f32.mrb[5].mxu1  ;;  %v639_v7 = vmul.f32 %v985_v1, %v586_v36  ;;  %v647_v8 = vmul.f32 %v993_v2, %v626_v0 }
  0xfc   : > { %v986_v5 = vpop.f32.mrb[6].mxu0  ;;  %v994_v6 = vpop.f32.mrb[6].mxu1  ;;  %v637_v13 = vmul.f32 %v576_v34, %v439_v3  ;;  %v645_v14 = vmul.f32 %v616_v42, %v471_v4 }
  0xfd   : > { %v640_v9 = vmul.f32 %v986_v5, %v591_v35  ;;  %v648_v10 = vmul.f32 %v994_v6, %v631_v63  ;;  %v442_v11 = vpop.f32.mrb[7].mxu0  ;;  %v474_v12 = vpop.f32.mrb[7].mxu1 }
  0xfe   : > { %v638_v15 = vmul.f32 %v581_v33, %v442_v11  ;;  %v646_v16 = vmul.f32 %v621_v41, %v474_v12 }
  0xff   : > { %v930_v17 = vpack.c.bf16 %v640_v9, %v639_v7  ;;  %v950_v18 = vpack.c.bf16 %v648_v10, %v647_v8 }
 0x100   : > { %v925_v19 = vpack.c.bf16 %v638_v15, %v637_v13  ;;  %v945_v20 = vpack.c.bf16 %v646_v16, %v645_v14 }
 0x101   : > { %954 = vst [vmem:[%s1292_s28 + $0x18] sm:$0xff] %v930_v17   ;;  %958 = vst [vmem:[%s1292_s28 + $0x38] sm:$0xff] %v950_v18  }
 0x102   : > { %953 = vst [vmem:[%s1292_s28 + $0x10] sm:$0xff] %v925_v19   ;;  %957 = vst [vmem:[%s1292_s28 + $0x30] sm:$0xff] %v945_v20  }
 0x103   : > { %1088 = shalt.err (!%p1085_p5)
}
 0x104   : > { %s1089_s11 = scalar_lea.hbm %s1303_s5, 1024  ;;  %s1093_s21 = scalar_lea.hbm %s1362_s3, 3072 }
 0x105   : > { %p1090_p6 = scmp.ne.s32.totalorder %s1303_s5, %s1089_s11  ;;  %p1094_p10 = scmp.lt.u32.totalorder %s1303_s5, %s1362_s3 }
 0x106   : > { %p1095_p11 = scmp.lt.u32.totalorder %s1093_s21, %s1089_s11  ;;  %p1097_p13 = scmp.lt.u32.totalorder %s1089_s11, %s1303_s5 }
 0x107   : > { %p1091_p7 = pnand %p1090_p6, %p1219_p4 }
 0x108   : > { %p1096_p12 = por %p1095_p11, %p1094_p10 }
 0x109   : > { %p1092_p9 = pneg %p1091_p7 }
 0x10a   : > { %p1098_p0 = por %p1097_p13, %p1096_p12 }
 0x10c   : > { %p1099_p1 = pnand %p1098_p0, %p1092_p9 }
 0x10e   : > { %1102 = shalt.err (!%p1099_p1)
}
 0x10f   : > { %s1157_s27 = smov 64   ;;  %s1158_s28 = smov 4  }
 0x110   : > { %1003 = dma.vmem_to_hbm [thread:$0]  (%p1219_p4), %s1305_s30, 1024, %s1303_s5, %s1313_s6, %s1157_s27, %s1157_s27, %s1158_s28  }
 0x111 PF: > { %p1009_p2 = scmp.ge.s32.totalorder %s1153_s17, 2  ;;  %s758_s29 = sand.u32 1, %s1133_s12  }
 0x112   : > { %s759_s15 = scalar_lea.sflag [#allocation4], %s758_s29 }
 0x113   : > { %p1006_p3 = pnand %p1009_p2, %p1226_p8 }
 0x115   : > { %1128 = dma.done.wait (!%p1006_p3), %s759_s15, 1024  }
 0x116   : > { %1130 = vsyncadd (!%p1006_p3), %s759_s15, 4294966272  ;;  %s16_s17 = sadd.s32 1, %s1153_s17   ;;  %s1365_s12 = smov %s1137_s13 }
 0x117   : > { %p13_p5 = scmp.ge.s32.totalorder %s16_s17, 5   ;;  %s1366_s13 = smov %s1141_s14 }
 0x118   : > { %s1367_s14 = smov %s1232_s25  ;;  %s1368_s15 = smov %s1149_s16 }
 0x119   : > { %s1369_s16 = smov %s1371_s20  ;;  %15 = sbr.rel (!%p13_p5) target bundleno = 4 (0x4), region = 81 }
 0x120   :  { %764 = vsyncpa [#allocation4], 1 }
 0x121   :  { %766 = vsyncpa [#allocation4 + $0x1], 1 }

</bundles_post_ra>
